<compile_context>
chip_gen: v7x
topology: tpu7x:2x2x1
jax: 0.10.0
libtpu: 0.0.40
codegen_flags: <defaults>
</compile_context>

<pallas_src>
import functools

import jax
import jax.numpy as jnp
from jax.experimental import pallas as pl
from jax.experimental.pallas import tpu as pltpu


_LANE = 128          # lane width of a TPU vreg
_SUBLANE_BF16 = 16   # bf16 sublane packing granularity


def _round_up(n: int, m: int) -> int:
    return ((n + m - 1) // m) * m


def _head_kernel(x_ref, w1_ref, b1_ref, w2_ref, b2_ref, o_ref):
    """One batch tile of the classification head.

    x_ref : (TB, H)   f32/bf16  CLS activations for this tile (pipelined DMA)
    w1_ref: (H, H)    bf16      dense weight    (VMEM-resident across steps)
    b1_ref: (1, H)    f32       dense bias      (resident)
    w2_ref: (H, LP)   bf16      out_proj weight, labels zero-padded to LP lanes
    b2_ref: (1, LP)   f32       out_proj bias, zero-padded
    o_ref : (TB, LP)  f32       logits (lane-dense, unmasked stores)
    """
    # Cast activations to bf16 in-kernel (avoids an extra HBM pass outside).
    x = x_ref[...].astype(jnp.bfloat16)
    # dense: bf16 x bf16 -> f32 accumulate on the MXU
    h = jnp.dot(x, w1_ref[...], preferred_element_type=jnp.float32)
    # bias + tanh in f32 (v5e vector/EUP units have no bf16 fast path)
    h = jnp.tanh(h + b1_ref[...])
    # second dot in bf16: halves vreg/VMEM pressure of the intermediate
    h = h.astype(jnp.bfloat16)
    out = jnp.dot(h, w2_ref[...], preferred_element_type=jnp.float32) + b2_ref[...]
    o_ref[...] = out.astype(o_ref.dtype)


def prepare_head_params(w_dense, b_dense, w_out, b_out):
    """One-time (model-load) preprocessing of the head parameters.

    w_dense : (H, H)  dense weight, stored (in_dim, out_dim) = nn.Linear.weight.T
    b_dense : (H,)
    w_out   : (H, L)  out_proj weight (in_dim, out_dim)
    b_out   : (L,)
    Returns (w1_bf16, b1_f32, w2_bf16_padded, b2_f32_padded).
    """
    H = w_dense.shape[0]
    L = w_out.shape[1]
    lp = _round_up(L, _LANE)                       # lane-dense label dim
    w1 = w_dense.astype(jnp.bfloat16)
    b1 = b_dense.reshape(1, H).astype(jnp.float32)
    w2 = jnp.pad(w_out, ((0, 0), (0, lp - L))).astype(jnp.bfloat16)
    b2 = jnp.pad(b_out, (0, lp - L)).reshape(1, lp).astype(jnp.float32)
    return w1, b1, w2, b2


@functools.partial(jax.jit, static_argnames=("num_labels", "block_b"))
def classification_head(features, w1, b1, w2, b2, *, num_labels, block_b=512):
    """XLM-R intent classification head (eval mode).

    features : (B, S, H) transformer features, CLS token at seq position 0
    w1,b1,w2,b2 : outputs of prepare_head_params (bf16 weights, padded labels)
    returns  : (B, num_labels) float32 logits
    """
    B, S, H = features.shape
    lp = w2.shape[1]

    # ---- CLS selection without an extra HBM pass. ----------------------------
    # Collapsing the trailing dims is a free (contiguous) reshape; the input
    # BlockSpec then selects column block 0 == features[:, 0, :] via a strided
    # DMA that only touches the CLS rows.
    if H % _LANE == 0:
        x_in = features.reshape(B, S * H)
    else:
        # TODO(synk): H not a lane multiple -> fall back to an XLA slice.
        x_in = features[:, 0, :]

    # Dropout is identity in eval mode (p=0.01 at train time).
    # TODO(synk): training-mode dropout (stochastic masking) not implemented.

    # ---- Batch tile selection. ------------------------------------------------
    # * multiple of 16 rows (bf16 sublane packing)
    # * aim for >=2 grid steps so the "parallel" axis spans both v7x TCs
    # * never larger than B (ragged last tile handled by Pallas edge masking)
    block_b = max(_SUBLANE_BF16, _round_up(block_b, _SUBLANE_BF16))
    tb = min(block_b, _round_up(pl.cdiv(B, 2), _SUBLANE_BF16), B)
    grid = (pl.cdiv(B, tb),)

    # ---- Explicit VMEM budget (portable across v5e/v6e/v7x). ------------------
    x_item = jnp.dtype(features.dtype).itemsize
    footprint = (2 * tb * H * x_item           # x double buffer
                 + 2 * H * H * 2               # dense weight (bf16, 2 bufs)
                 + 2 * H * lp * 2              # out_proj weight (bf16, 2 bufs)
                 + 2 * (H + lp) * 4            # biases
                 + 2 * tb * lp * 4             # logits double buffer
                 + tb * H * 4)                 # f32 intermediate
    vmem_limit = int(min(max(2 * footprint, 32 * 1024 * 1024), 64 * 1024 * 1024))

    logits = pl.pallas_call(
        _head_kernel,
        out_shape=jax.ShapeDtypeStruct((B, lp), jnp.float32),
        grid=grid,
        in_specs=[
            # activations: one (tb, H) tile per grid step -> double-buffered,
            # strided DMA of the CLS rows only
            pl.BlockSpec((tb, H), lambda i: (i, 0)),
            # weights / biases: constant block index -> fetched once, resident
            pl.BlockSpec((H, H), lambda i: (0, 0)),
            pl.BlockSpec((1, H), lambda i: (0, 0)),
            pl.BlockSpec((H, lp), lambda i: (0, 0)),
            pl.BlockSpec((1, lp), lambda i: (0, 0)),
        ],
        out_specs=pl.BlockSpec((tb, lp), lambda i: (i, 0)),
        compiler_params=pltpu.CompilerParams(
            # batch tiles are independent -> shard across both TCs on v7x
            dimension_semantics=("parallel",),
            vmem_limit_bytes=vmem_limit,
        ),
    )(x_in, w1, b1, w2, b2)

    # Strip the lane padding of the label dimension.
    return logits[:, :num_labels]


def reference_f32(features, w_dense, b_dense, w_out, b_out):
    """Pure-f32 reference (module semantics, eval mode)."""
    x = features[:, 0, :]
    x = jnp.tanh(x @ w_dense + b_dense)
    return x @ w_out + b_out


def reference_bf16(features, w_dense, b_dense, w_out, b_out):
    """Reference emulating the kernel's bf16-operand / f32-accumulate path."""
    x = features[:, 0, :].astype(jnp.bfloat16)
    h = jnp.dot(x, w_dense.astype(jnp.bfloat16),
                preferred_element_type=jnp.float32) + b_dense
    h = jnp.tanh(h).astype(jnp.bfloat16)
    return jnp.dot(h, w_out.astype(jnp.bfloat16),
                   preferred_element_type=jnp.float32) + b_out


def _run_case(key, B, S, H, L):
    k_feat, k_w1, k_b1, k_w2, k_b2 = jax.random.split(key, 5)
    features = jax.random.normal(k_feat, (B, S, H), dtype=jnp.float32)

    # PyTorch-Linear-like init (uniform, 1/sqrt(fan_in)); weights stored as
    # (in_dim, out_dim), i.e. the transpose of nn.Linear.weight.
    bound = 1.0 / (H ** 0.5)
    w_dense = jax.random.uniform(k_w1, (H, H), jnp.float32, -bound, bound)
    b_dense = jax.random.uniform(k_b1, (H,), jnp.float32, -bound, bound)
    w_out = jax.random.uniform(k_w2, (H, L), jnp.float32, -bound, bound)
    b_out = jax.random.uniform(k_b2, (L,), jnp.float32, -bound, bound)

    # Model-load-time preprocessing (bf16 cast + label lane-padding), done once.
    w1, b1, w2, b2 = prepare_head_params(w_dense, b_dense, w_out, b_out)

    out = classification_head(features, w1, b1, w2, b2, num_labels=L)
    out = jax.block_until_ready(out)
    assert out.shape == (B, L), out.shape

    ref_bf = reference_bf16(features, w_dense, b_dense, w_out, b_out)
    ref_f32 = reference_f32(features, w_dense, b_dense, w_out, b_out)
    assert jnp.allclose(out, ref_bf, atol=2e-2, rtol=2e-2), \
        f"mismatch vs bf16 reference (B={B},H={H},L={L})"
    assert jnp.allclose(out, ref_f32, atol=1e-1, rtol=1e-1), \
        f"mismatch vs f32 reference (B={B},H={H},L={L})"


if __name__ == "__main__":
    key = jax.random.PRNGKey(0)
    k1, k2 = jax.random.split(key)

    # Small shapes consistent with the module: batch=2, seq=8, hidden=128, labels=8
    _run_case(k1, B=2, S=8, H=128, L=8)
    # Multi-step grid + ragged last batch tile + lane-padded label dim.
    _run_case(k2, B=20, S=4, H=256, L=10)

    print("KERNEL_OK")
</pallas_src>

<mosaic_0001>
module attributes {stable_mosaic.version = 11 : i64} {
  func.func @_head_kernel(%arg0: i32, %arg1: memref<2x128xf32, #tpu.memory_space<vmem>>, %arg2: memref<128x128xbf16, #tpu.memory_space<vmem>>, %arg3: memref<1x128xf32, #tpu.memory_space<vmem>>, %arg4: memref<128x128xbf16, #tpu.memory_space<vmem>>, %arg5: memref<1x128xf32, #tpu.memory_space<vmem>>, %arg6: memref<2x128xf32, #tpu.memory_space<vmem>>) attributes {dimension_semantics = [#tpu.dimension_semantics<parallel>], iteration_bounds = array<i64: 1>, scalar_prefetch = 0 : i64, scratch_operands = 0 : i64, tpu.core_type = #tpu.core_type<tc>, window_params = [{transform_indices = @transform_0, window_bounds = array<i64: 2, 128>}, {pipeline_mode = #tpu.pipeline_mode<synchronous>, transform_indices = @transform_1, window_bounds = array<i64: 128, 128>}, {pipeline_mode = #tpu.pipeline_mode<synchronous>, transform_indices = @transform_2, window_bounds = array<i64: 1, 128>}, {pipeline_mode = #tpu.pipeline_mode<synchronous>, transform_indices = @transform_3, window_bounds = array<i64: 128, 128>}, {pipeline_mode = #tpu.pipeline_mode<synchronous>, transform_indices = @transform_4, window_bounds = array<i64: 1, 128>}, {transform_indices = @transform_5, window_bounds = array<i64: 2, 128>}]} {
    %c0 = arith.constant 0 : index
    %c0_0 = arith.constant 0 : index
    %0 = vector.load %arg1[%c0, %c0_0] : memref<2x128xf32, #tpu.memory_space<vmem>>, vector<2x128xf32>
    %1 = arith.truncf %0 : vector<2x128xf32> to vector<2x128xbf16>
    %c0_1 = arith.constant 0 : index
    %c0_2 = arith.constant 0 : index
    %2 = vector.load %arg2[%c0_1, %c0_2] : memref<128x128xbf16, #tpu.memory_space<vmem>>, vector<128x128xbf16>
    %cst = arith.constant dense<0.000000e+00> : vector<2x128xf32>
    %3 = tpu.matmul %1, %2, %cst {dimension_numbers = #tpu.dot_dimension_numbers<[1], [0], [0], [1], [0, 0, 1, 1], [], []>} : vector<2x128xbf16>, vector<128x128xbf16>, vector<2x128xf32> -> vector<2x128xf32>
    %c0_3 = arith.constant 0 : index
    %c0_4 = arith.constant 0 : index
    %4 = vector.load %arg3[%c0_3, %c0_4] : memref<1x128xf32, #tpu.memory_space<vmem>>, vector<1x128xf32>
    %5 = vector.broadcast %4 : vector<1x128xf32> to vector<2x128xf32>
    %6 = arith.addf %3, %5 : vector<2x128xf32>
    %7 = math.tanh %6 : vector<2x128xf32>
    %8 = arith.truncf %7 : vector<2x128xf32> to vector<2x128xbf16>
    %c0_5 = arith.constant 0 : index
    %c0_6 = arith.constant 0 : index
    %9 = vector.load %arg4[%c0_5, %c0_6] : memref<128x128xbf16, #tpu.memory_space<vmem>>, vector<128x128xbf16>
    %cst_7 = arith.constant dense<0.000000e+00> : vector<2x128xf32>
    %10 = tpu.matmul %8, %9, %cst_7 {dimension_numbers = #tpu.dot_dimension_numbers<[1], [0], [0], [1], [0, 0, 1, 1], [], []>} : vector<2x128xbf16>, vector<128x128xbf16>, vector<2x128xf32> -> vector<2x128xf32>
    %c0_8 = arith.constant 0 : index
    %c0_9 = arith.constant 0 : index
    %11 = vector.load %arg5[%c0_8, %c0_9] : memref<1x128xf32, #tpu.memory_space<vmem>>, vector<1x128xf32>
    %12 = vector.broadcast %11 : vector<1x128xf32> to vector<2x128xf32>
    %13 = arith.addf %10, %12 : vector<2x128xf32>
    %c0_10 = arith.constant 0 : index
    %c0_11 = arith.constant 0 : index
    %14 = vector.load %arg6[%c0_10, %c0_11] : memref<2x128xf32, #tpu.memory_space<vmem>>, vector<2x128xf32>
    tpu.vector_store %arg6[%c0_10, %c0_11], %13 {strides = array<i32>} : memref<2x128xf32, #tpu.memory_space<vmem>>, vector<2x128xf32>,
    return
  }
  func.func @transform_0(%arg0: i32) -> (i32, i32) {
    %c0_i32 = arith.constant 0 : i32
    %c0_i32_0 = arith.constant 0 : i32
    return %arg0, %c0_i32 : i32, i32
  }
  func.func @transform_1(%arg0: i32) -> (i32, i32) {
    %c0_i32 = arith.constant 0 : i32
    %c0_i32_0 = arith.constant 0 : i32
    %c0_i32_1 = arith.constant 0 : i32
    return %c0_i32, %c0_i32_0 : i32, i32
  }
  func.func @transform_2(%arg0: i32) -> (i32, i32) {
    %c0_i32 = arith.constant 0 : i32
    %c0_i32_0 = arith.constant 0 : i32
    %c0_i32_1 = arith.constant 0 : i32
    return %c0_i32, %c0_i32_0 : i32, i32
  }
  func.func @transform_3(%arg0: i32) -> (i32, i32) {
    %c0_i32 = arith.constant 0 : i32
    %c0_i32_0 = arith.constant 0 : i32
    %c0_i32_1 = arith.constant 0 : i32
    return %c0_i32, %c0_i32_0 : i32, i32
  }
  func.func @transform_4(%arg0: i32) -> (i32, i32) {
    %c0_i32 = arith.constant 0 : i32
    %c0_i32_0 = arith.constant 0 : i32
    %c0_i32_1 = arith.constant 0 : i32
    return %c0_i32, %c0_i32_0 : i32, i32
  }
  func.func @transform_5(%arg0: i32) -> (i32, i32) {
    %c0_i32 = arith.constant 0 : i32
    %c0_i32_0 = arith.constant 0 : i32
    return %arg0, %c0_i32 : i32, i32
  }
}

</mosaic_0001>

<bundles_post_ra>
// kernel: classification_head.1
= control target key start
LH: loop header
LB: loop body
LE: loop exit
PB: predicated region body
PF: predicated region fallthrough
CT: control target
= control target key end

     0   :  { %10 = vsyncpa [#allocation3], 0  ;;  %s548_s0 = inlined_call_operand.vmem [shape: f32[2,1024], index: 0, kind: input, shape index: {}]   ;;  %s549_s1 = inlined_call_operand.hbm [shape: bf16[128,128], index: 1, kind: input, shape index: {}]   ;;  %s550_s2 = inlined_call_operand.vmem [shape: f32[1,128], index: 2, kind: input, shape index: {}]   ;;  %s551_s3 = inlined_call_operand.hbm [shape: bf16[128,128], index: 3, kind: input, shape index: {}]   ;;  %s552_s4 = inlined_call_operand.vmem [shape: f32[1,128], index: 4, kind: input, shape index: {}]   ;;  %s553_s5 = inlined_call_operand.hbm [shape: f32[2,128], index: 5, kind: output, shape index: {}]  }
   0x1   :  { %11 = vsyncpa [#allocation6], 0 }
   0x2   :  { %12 = vsyncpa [#allocation4], 0  ;;  %s466_s18 = smov [#allocation2]   ;;  %s394_s22 = scalar_lea.hbm %s549_s1, 1024 }
   0x3   :  { %s20_s19 = sshll.u32 %s466_s18, 4  ;;  %p395_p0 = scmp.ne.s32.totalorder %s549_s1, %s394_s22  ;;  %s21_s19 = int_to_ptr.vmem [resolvable:$true] %s20_s19 }
   0x4   :  { %p398_p1 = scmp.lt.u32.totalorder %s394_s22, %s549_s1 }
   0x6   :  { %p400_p2 = pnand %p398_p1, %p395_p0 }
   0x8   :  { %403 = shalt.err (!%p400_p2)
}
   0x9   :  { %s404_s27 = scalar_lea.vmem %s21_s19, 1024  ;;  %p409_p4 = scmp.lt.s32.totalorder %s21_s19, %s21_s19 }
   0xa   :  { %p405_p3 = scmp.ne.s32.totalorder %s21_s19, %s404_s27  ;;  %p410_p5 = scmp.lt.s32.totalorder %s404_s27, %s404_s27 }
   0xc   :  { %p411_p6 = por %p410_p5, %p409_p4 }
   0xe   :  { %p412_p7 = pnand %p411_p6, %p405_p3 }
  0x10   :  { %415 = shalt.err (!%p412_p7)
}
  0x11   :  { %s467_s28 = smov 64   ;;  %s468_s29 = smov 4  }
  0x12   :  { %26 = dma.hbm_to_vmem [thread:$0]  %s549_s1, 1024, %s21_s19, [#allocation3], %s467_s28, %s467_s28, %s468_s29  }
  0x13   :  { %s469_s7 = smov [#allocation5]   ;;  %s416_s11 = scalar_lea.hbm %s551_s3, 1024 }
  0x14   :  { %s34_s8 = sshll.u32 %s469_s7, 4  ;;  %p417_p8 = scmp.ne.s32.totalorder %s551_s3, %s416_s11  ;;  %s35_s8 = int_to_ptr.vmem [resolvable:$true] %s34_s8 }
  0x15   :  { %p420_p9 = scmp.lt.u32.totalorder %s416_s11, %s551_s3 }
  0x17   :  { %p422_p10 = pnand %p420_p9, %p417_p8 }
  0x19   :  { %425 = shalt.err (!%p422_p10)
}
  0x1a   :  { %s426_s16 = scalar_lea.vmem %s35_s8, 1024  ;;  %p431_p12 = scmp.lt.s32.totalorder %s35_s8, %s35_s8 }
  0x1b   :  { %p427_p11 = scmp.ne.s32.totalorder %s35_s8, %s426_s16  ;;  %p432_p13 = scmp.lt.s32.totalorder %s426_s16, %s426_s16 }
  0x1d   :  { %p433_p0 = por %p432_p13, %p431_p12 }
  0x1f   :  { %p434_p1 = pnand %p433_p0, %p427_p11 }
  0x21   :  { %437 = shalt.err (!%p434_p1)
}
  0x22   :  { %40 = dma.hbm_to_vmem [thread:$0]  %s551_s3, 1024, %s35_s8, [#allocation6], %s467_s28, %s467_s28, %s468_s29  }
  0x23   :  { %460 = dma.done.wait [#allocation3], 1024  }
  0x24   :  { %461 = vsyncadd [#allocation3], 4294966272 }
  0x25   :  { %462 = dma.done.wait [#allocation6], 1024  }
  0x26   :  { %463 = vsyncadd [#allocation6], 4294966272  ;;  %v470_v0 = vmov 0.0   ;;  %vm471_vm0 = vmmov 0   ;;  %v376_v1 = vld [vmem:[#allocation2] sm:$0xff]   ;;  %v377_v2 = vld [vmem:[#allocation2 + $0x8] sm:$0xff]  }
  0x27   :  { %329 = vmatprep.subr.bf16.mxu0 %v470_v0  ;;  %345 = vmatprep.mubr.msk.bf16.mxu0 %vm471_vm0, %v470_v0  ;;  %v378_v3 = vld [vmem:[#allocation2 + $0x10] sm:$0xff]   ;;  %v384_v4 = vld [vmem:[#allocation5] sm:$0xff]   ;;  %v379_v5 = vld [vmem:[#allocation2 + $0x18] sm:$0xff]   ;;  %s472_s22 = smov [#allocation7]  }
  0x28   :  { %349 = vmatprep.subr.bf16.mxu1 %v470_v0  ;;  %365 = vmatprep.mubr.msk.bf16.mxu1 %vm471_vm0, %v470_v0  ;;  %v385_v6 = vld [vmem:[#allocation5 + $0x8] sm:$0xff]   ;;  %v380_v7 = vld [vmem:[#allocation2 + $0x20] sm:$0xff]   ;;  %v386_v8 = vld [vmem:[#allocation5 + $0x10] sm:$0xff]   ;;  %s283_s23 = sshll.u32 %s472_s22, 4  ;;  %s284_s23 = int_to_ptr.vmem [resolvable:$true] %s283_s23 }
  0x29   :  { %330 = vmatpush3.bf16.msra.mxu0 %v376_v1  ;;  %350 = vmatpush3.bf16.msra.mxu1 %v384_v4  ;;  %v381_v9 = vld [vmem:[#allocation2 + $0x28] sm:$0xff]   ;;  %v387_v10 = vld [vmem:[#allocation5 + $0x18] sm:$0xff]   ;;  %v382_v11 = vld [vmem:[#allocation2 + $0x30] sm:$0xff]   ;;  %p443_p3 = scmp.lt.s32.totalorder %s284_s23, %s284_s23 }
  0x2a   :  { %331 = vmatprep.subr.bf16.mxu0 %v470_v0  ;;  %351 = vmatprep.subr.bf16.mxu1 %v470_v0  ;;  %v383_v12 = vld [vmem:[#allocation2 + $0x38] sm:$0xff]   ;;  %v50_v13 = vld [vmem:[%s548_s0] sm:$0x3]  ;;  %v389_v16 = vld [vmem:[#allocation5 + $0x28] sm:$0xff]  }
  0x2b   :  { %v51_v14 = vpack.c.bf16 %v50_v13, %v50_v13  ;;  %v388_v15 = vld [vmem:[#allocation5 + $0x20] sm:$0xff]   ;;  %v390_v17 = vld [vmem:[#allocation5 + $0x30] sm:$0xff]   ;;  %v391_v18 = vld [vmem:[#allocation5 + $0x38] sm:$0xff]  }
  0x2c   :  { %v293_v19 = vld [vmem:[%s550_s2] ss:$0 sm:$0xff]  ;;  %s438_s2 = scalar_lea.vmem %s284_s23, 32 }
  0x2d   :  { %332 = vmatpush3.bf16.msra.mxu0 %v377_v2  ;;  %352 = vmatpush3.bf16.msra.mxu1 %v385_v6  ;;  %v302_v27 = vld [vmem:[%s552_s4] ss:$0 sm:$0xff]  ;;  %p439_p2 = scmp.ne.s32.totalorder %s284_s23, %s438_s2  ;;  %p444_p4 = scmp.lt.s32.totalorder %s438_s2, %s438_s2 }
  0x2e   :  { %333 = vmatprep.subr.bf16.mxu0 %v470_v0  ;;  %353 = vmatprep.subr.bf16.mxu1 %v470_v0 }
  0x2f   :  { %p445_p5 = por %p444_p4, %p443_p3 }
  0x31   :  { %334 = vmatpush3.bf16.msra.mxu0 %v378_v3  ;;  %354 = vmatpush3.bf16.msra.mxu1 %v386_v8  ;;  %p446_p6 = pnand %p445_p5, %p439_p2 }
  0x32   :  { %335 = vmatprep.subr.bf16.mxu0 %v470_v0  ;;  %355 = vmatprep.subr.bf16.mxu1 %v470_v0 }
  0x35   :  { %336 = vmatpush3.bf16.msra.mxu0 %v379_v5  ;;  %356 = vmatpush3.bf16.msra.mxu1 %v387_v10 }
  0x36   :  { %337 = vmatprep.subr.bf16.mxu0 %v470_v0  ;;  %357 = vmatprep.subr.bf16.mxu1 %v470_v0 }
  0x39   :  { %338 = vmatpush3.bf16.msra.mxu0 %v380_v7  ;;  %358 = vmatpush3.bf16.msra.mxu1 %v388_v15 }
  0x3a   :  { %339 = vmatprep.subr.bf16.mxu0 %v470_v0  ;;  %359 = vmatprep.subr.bf16.mxu1 %v470_v0 }
  0x3d   :  { %340 = vmatpush3.bf16.msra.mxu0 %v381_v9  ;;  %360 = vmatpush3.bf16.msra.mxu1 %v389_v16 }
  0x3e   :  { %341 = vmatprep.subr.bf16.mxu0 %v470_v0  ;;  %361 = vmatprep.subr.bf16.mxu1 %v470_v0 }
  0x41   :  { %342 = vmatpush3.bf16.msra.mxu0 %v382_v11  ;;  %362 = vmatpush3.bf16.msra.mxu1 %v390_v17 }
  0x42   :  { %343 = vmatprep.subr.bf16.mxu0 %v470_v0  ;;  %363 = vmatprep.subr.bf16.mxu1 %v470_v0 }
  0x45   :  { %344 = vmatpush3.bf16.msra.mxu0 %v383_v12  ;;  %364 = vmatpush3.bf16.msra.mxu1 %v391_v18 }
  0x48   :  { %346 = vmatmul.mubr.bf16.vlgmr.msra.gmra.mrb[0].mxu0 %v51_v14 }
 0x11b   :  { %v157_v20 = vpop.f32.mrb[0].mxu0 }
 0x11c   :  { %v158_v21 = vadd.f32 %v293_v19, %v157_v20  ;;  %v347_v22 = vpop.f32.mrb[1].mxu0 }
 0x11d   :  { %v160_v23 = vpop.f32.mrb[2].mxu0 }
 0x11e   :  { %392 = vtanh.f32 %v158_v21  ;;  %v348_v24 = vpop.f32.mrb[3].mxu0 }
 0x128   :  { %v393_v25 = vpop.eup %392 }
 0x129   :  { %v164_v26 = vpack.c.bf16 %v393_v25, %v393_v25 }
 0x12b   :  { %366 = vmatmul.mubr.bf16.vlgmr.msra.gmra.mrb[0].mxu1 %v164_v26 }
 0x1fe   :  { %v270_v28 = vpop.f32.mrb[0].mxu1 }
 0x1ff   :  { %v271_v29 = vadd.f32 %v302_v27, %v270_v28  ;;  %v367_v30 = vpop.f32.mrb[1].mxu1 }
 0x200   :  { %v273_v31 = vpop.f32.mrb[2].mxu1 }
 0x201   :  { %276 = vst [vmem:[#allocation7] sm:$0x3] %v271_v29  ;;  %v368_v32 = vpop.f32.mrb[3].mxu1 }
 0x202   :  { %449 = shalt.err (!%p446_p6)
}
 0x203   :  { %s450_s4 = scalar_lea.hbm %s553_s5, 32 }
 0x204   :  { %p451_p7 = scmp.ne.s32.totalorder %s553_s5, %s450_s4  ;;  %p454_p8 = scmp.lt.u32.totalorder %s450_s4, %s553_s5 }
 0x206   :  { %p456_p9 = pnand %p454_p8, %p451_p7 }
 0x208   :  { %459 = shalt.err (!%p456_p9)
}
 0x209   :  { %286 = dma.vmem_to_hbm [thread:$0]  %s284_s23, 32, %s553_s5, [#allocation4]  }
 0x20a   :  { %464 = dma.done.wait [#allocation4], 32  }
 0x20b   :  { %465 = vsyncadd [#allocation4], 4294967264 }
 0x20c   :  { %290 = vsyncpa [#allocation3], 1 }
 0x20d   :  { %291 = vsyncpa [#allocation6], 1 }
 0x20e   :  { %292 = vsyncpa [#allocation4], 1 }

</bundles_post_ra>
